<compile_context>
chip_gen: v7x
topology: tpu7x:2x2x1
jax: 0.10.0
libtpu: 0.0.40
codegen_flags: <defaults>
</compile_context>

<pallas_src>
import functools

import jax
import jax.numpy as jnp
from jax.experimental import pallas as pl
from jax.experimental.pallas import tpu as pltpu


# ----------------------------------------------------------------------------
# Fused kernel: LSTM over time (last hidden state) -> per-action MLP Q-head.
# ----------------------------------------------------------------------------
def _lstm_mlp_fused_kernel(x_ref, wih_ref, whh_ref, b_ref,
                           act_ref, w1s_ref, w1a_ref, b1_ref,
                           w2_ref, b2_ref, w3_ref, b3_ref,
                           q_ref, *, seq_len, batch, num_actions, hidden_dim,
                           apply_tanh):
    """Shapes:
      x_ref:   (T*B, S)   time-major flattened state history
      wih_ref: (S, 4H)    weight_ih_l0.T  (gate order i,f,g,o; g-cols pre-scaled x2)
      whh_ref: (H, 4H)    weight_hh_l0.T  (g-cols pre-scaled x2)
      b_ref:   (1, 4H)    bias_ih + bias_hh (g-cols pre-scaled x2)
      act_ref: (B*A, AD)  flattened action features
      w1s_ref: (H, hid)   state part of input_layer weight (transposed)
      w1a_ref: (AD, hid)  action part of input_layer weight (transposed)
      b1_ref:  (1, hid)
      w2_ref:  (hid, hid) hidden_layer weight (transposed)
      b2_ref:  (1, hid)
      w3_ref:  (1, hid)   output_layer weight (row form)
      b3_ref:  (1,)       output_layer bias (SMEM scalar)
      q_ref:   (B, A)     Q-values (single lane-dense store)
    """
    T, B, A, H = seq_len, batch, num_actions, hidden_dim
    neg = 0.01  # F.leaky_relu default slope

    # ---------------- LSTM encoder ----------------
    whh = whh_ref[...]                                         # (H, 4H)

    # Hoisted input projection: ONE MXU push for all T*B rows, bias folded in once.
    x_proj = (jnp.dot(x_ref[...], wih_ref[...],
                      preferred_element_type=jnp.float32)
              + b_ref[...])                                    # (T*B, 4H)
    # Leading-T layout: per-step read x_proj[t] is tile-granular (whole vreg), not a
    # mid-vreg sublane extraction of B=2 rows from the packed slab.  One relayout,
    # outside the serial recurrence.
    x_proj = x_proj.reshape(T, B, 4 * H)

    h = jnp.zeros((B, H), jnp.float32)
    c = jnp.zeros((B, H), jnp.float32)
    # TODO(synk): make whh weight-stationary in the MXU (matmul_push_rhs once +
    # matmul_acc_lhs/matmul_pop per step) instead of T independent jnp.dot pushes.
    for t in range(T):  # static unroll: per-step critical path is one (B,H)x(H,4H) dot
        gates = x_proj[t] + jnp.dot(h, whh,
                                    preferred_element_type=jnp.float32)  # (B, 4H)
        # Single EUP push over the full 4H width.  The g-gate columns were pre-scaled
        # by 2 in the wrapper, so tanh(z) = 2*sigmoid(2z) - 1 is recovered on the VPU.
        sig = jax.nn.sigmoid(gates)
        i_g = sig[:, 0 * H:1 * H]
        f_g = sig[:, 1 * H:2 * H]
        g_g = 2.0 * sig[:, 2 * H:3 * H] - 1.0
        o_g = sig[:, 3 * H:4 * H]
        c = f_g * c + i_g * g_g
        h = o_g * jnp.tanh(c)
    # h: (B, H) == lstm_out[:, -1, :]

    # ---------------- MLP Q-head: flat 2-D MXU dots over the (B*A) row axis ----------
    hid = w1s_ref.shape[1]

    # concat([state, act]) @ W1.T + b1 == act @ W1a.T + (state @ W1s.T + b1)
    s_proj = (jnp.dot(h, w1s_ref[...], preferred_element_type=jnp.float32)
              + b1_ref[...])                                   # (B, hid)
    x = jnp.dot(act_ref[...], w1a_ref[...],
                preferred_element_type=jnp.float32)            # (B*A, hid)
    x = x.reshape(B, A, hid) + s_proj[:, None, :]              # (B, A, hid)
    x = jnp.maximum(x, neg * x)                                # leaky_relu

    x = (jnp.dot(x.reshape(B * A, hid), w2_ref[...],
                 preferred_element_type=jnp.float32)
         + b2_ref[...])                                        # (B*A, hid)
    x = jnp.maximum(x, neg * x)

    # Final (hid -> 1) projection as VPU multiply + lane reduction (no N=1 MXU dot).
    q = jnp.sum(x.reshape(B, A, hid) * w3_ref[...][None, :, :], axis=-1)  # (B, A)
    q = q + b3_ref[0]
    if apply_tanh:
        q = jnp.tanh(q)
    # TODO(synk): pad / round A toward 128 lanes at real action counts so this store
    # is an unmasked vst instead of a masked partial store.
    q_ref[...] = q


# ----------------------------------------------------------------------------
# Wrapper (weight transposes / bias packing / g-gate pre-scaling stay in plain JAX).
# ----------------------------------------------------------------------------
def lstm_network_forward(params, states, action_features, *, apply_tanh=True):
    states = states.astype(jnp.float32)
    action_features = action_features.astype(jnp.float32)
    B, T, S = states.shape
    _, A, AD = action_features.shape
    H = params["lstm_w_hh"].shape[1]

    vmem = pl.BlockSpec(memory_space=pltpu.MemorySpace.VMEM)
    smem = pl.BlockSpec(memory_space=pltpu.MemorySpace.SMEM)

    # Time-major, flattened to (T*B, S) so the input projection is one big matmul.
    # TODO(synk): at real sizes store the history time-major upstream or stream time
    # chunks via a BlockSpec grid so this transpose isn't an extra HBM pass.
    x_flat = jnp.transpose(states, (1, 0, 2)).reshape(T * B, S)

    # LSTM weights transposed; g-gate (2H:3H) columns pre-scaled by 2 so the kernel can
    # use one sigmoid EUP push and recover tanh via tanh(z) = 2*sigmoid(2z) - 1.
    wih_t = params["lstm_w_ih"].T                             # (S, 4H)
    whh_t = params["lstm_w_hh"].T                             # (H, 4H)
    bias = (params["lstm_b_ih"] + params["lstm_b_hh"])[None, :]  # (1, 4H)
    wih_t = wih_t.at[:, 2 * H:3 * H].multiply(2.0)
    whh_t = whh_t.at[:, 2 * H:3 * H].multiply(2.0)
    bias = bias.at[:, 2 * H:3 * H].multiply(2.0)

    w1 = params["mlp_w1"]                                     # (hid, H + AD)
    w1s_t = w1[:, :H].T                                       # (H, hid)
    w1a_t = w1[:, H:].T                                       # (AD, hid)
    b1 = params["mlp_b1"][None, :]                            # (1, hid)
    w2_t = params["mlp_w2"].T                                 # (hid, hid)
    b2 = params["mlp_b2"][None, :]                            # (1, hid)
    w3_row = params["mlp_w3"]                                 # (1, hid)
    b3 = params["mlp_b3"].reshape(1).astype(jnp.float32)      # (1,) scalar via SMEM

    act_flat = action_features.reshape(B * A, AD)             # (B*A, AD)

    q = pl.pallas_call(
        functools.partial(_lstm_mlp_fused_kernel, seq_len=T, batch=B,
                          num_actions=A, hidden_dim=H, apply_tanh=apply_tanh),
        out_shape=jax.ShapeDtypeStruct((B, A), jnp.float32),
        in_specs=[vmem] * 11 + [smem],
        out_specs=vmem,
        # 32 MiB fits within the default scoped limit on v5e/v6e/v7x alike.
        # TODO(synk): per-generation VMEM budgeting once the T-streaming path exists
        # (v7x has only 64 MiB physical VMEM; account for 2x double-buffering).
        compiler_params=pltpu.CompilerParams(vmem_limit_bytes=32 * 1024 * 1024),
    )(x_flat, wih_t, whh_t, bias, act_flat,
      w1s_t, w1a_t, b1, w2_t, b2, w3_row, b3)

    return q  # (B, A)   (task_offset in the reference is all-zeros -> no-op)


# ----------------------------------------------------------------------------
# Pure-JAX reference (same math as the PyTorch module, unmodified weights).
# ----------------------------------------------------------------------------
def reference_forward(params, states, action_features, *, apply_tanh=True):
    B, T, S = states.shape
    H = params["lstm_w_hh"].shape[1]
    wih, whh = params["lstm_w_ih"], params["lstm_w_hh"]
    bias = params["lstm_b_ih"] + params["lstm_b_hh"]
    h = jnp.zeros((B, H), jnp.float32)
    c = jnp.zeros((B, H), jnp.float32)
    for t in range(T):
        gates = states[:, t, :] @ wih.T + h @ whh.T + bias
        i_g = jax.nn.sigmoid(gates[:, 0 * H:1 * H])
        f_g = jax.nn.sigmoid(gates[:, 1 * H:2 * H])
        g_g = jnp.tanh(gates[:, 2 * H:3 * H])
        o_g = jax.nn.sigmoid(gates[:, 3 * H:4 * H])
        c = f_g * c + i_g * g_g
        h = o_g * jnp.tanh(c)
    A = action_features.shape[1]
    sa = jnp.concatenate(
        [jnp.broadcast_to(h[:, None, :], (B, A, H)), action_features], axis=-1)
    x = sa @ params["mlp_w1"].T + params["mlp_b1"]
    x = jnp.where(x > 0, x, 0.01 * x)
    x = x @ params["mlp_w2"].T + params["mlp_b2"]
    x = jnp.where(x > 0, x, 0.01 * x)
    logits = x @ params["mlp_w3"].T + params["mlp_b3"]
    if apply_tanh:
        logits = jnp.tanh(logits)
    return logits[..., 0]


def make_params(key, state_dim, action_dim, hidden_dim):
    ks = jax.random.split(key, 10)
    f = jnp.float32
    n = lambda k, shape, s=0.1: (s * jax.random.normal(k, shape)).astype(f)
    return {
        "lstm_w_ih": n(ks[0], (4 * hidden_dim, state_dim)),
        "lstm_w_hh": n(ks[1], (4 * hidden_dim, hidden_dim)),
        "lstm_b_ih": n(ks[2], (4 * hidden_dim,)),
        "lstm_b_hh": n(ks[3], (4 * hidden_dim,)),
        "mlp_w1": n(ks[4], (hidden_dim, hidden_dim + action_dim)),
        "mlp_b1": n(ks[5], (hidden_dim,)),
        "mlp_w2": n(ks[6], (hidden_dim, hidden_dim)),
        "mlp_b2": n(ks[7], (hidden_dim,)),
        "mlp_w3": n(ks[8], (1, hidden_dim)),
        "mlp_b3": n(ks[9], (1,)),
    }


if __name__ == "__main__":
    B, T, STATE_DIM, ACTION_DIM, HIDDEN_DIM, NUM_ACTIONS = 2, 8, 16, 8, 32, 5

    key = jax.random.PRNGKey(0)
    k_params, k_states, k_actions = jax.random.split(key, 3)

    params = make_params(k_params, STATE_DIM, ACTION_DIM, HIDDEN_DIM)
    states = jax.random.normal(k_states, (B, T, STATE_DIM), dtype=jnp.float32)
    action_features = jax.random.normal(
        k_actions, (B, NUM_ACTIONS, ACTION_DIM), dtype=jnp.float32)

    q = lstm_network_forward(params, states, action_features, apply_tanh=True)
    q = jax.block_until_ready(q)

    q_ref = reference_forward(params, states, action_features, apply_tanh=True)
    assert q.shape == (B, NUM_ACTIONS)
    # Slightly relaxed tolerance: the kernel uses tanh(z) = 2*sigmoid(2z) - 1 for the
    # LSTM g-gate (different EUP approximation path than a direct tanh).
    assert jnp.allclose(q, q_ref, atol=1e-4, rtol=1e-4), (q, q_ref)

    print("KERNEL_OK")
</pallas_src>

<mosaic_0001>
module attributes {stable_mosaic.version = 11 : i64} {
  func.func @_lstm_mlp_fused_kernel(%arg0: memref<16x16xf32, #tpu.memory_space<vmem>>, %arg1: memref<16x128xf32, #tpu.memory_space<vmem>>, %arg2: memref<32x128xf32, #tpu.memory_space<vmem>>, %arg3: memref<1x128xf32, #tpu.memory_space<vmem>>, %arg4: memref<10x8xf32, #tpu.memory_space<vmem>>, %arg5: memref<32x32xf32, #tpu.memory_space<vmem>>, %arg6: memref<8x32xf32, #tpu.memory_space<vmem>>, %arg7: memref<1x32xf32, #tpu.memory_space<vmem>>, %arg8: memref<32x32xf32, #tpu.memory_space<vmem>>, %arg9: memref<1x32xf32, #tpu.memory_space<vmem>>, %arg10: memref<1x32xf32, #tpu.memory_space<vmem>>, %arg11: memref<1xf32, #tpu.memory_space<smem>>, %arg12: memref<2x5xf32, #tpu.memory_space<vmem>>) attributes {dimension_semantics = [], scalar_prefetch = 0 : i64, scratch_operands = 0 : i64, tpu.core_type = #tpu.core_type<tc>} {
    %c0 = arith.constant 0 : index
    %c0_0 = arith.constant 0 : index
    %0 = vector.load %arg2[%c0, %c0_0] : memref<32x128xf32, #tpu.memory_space<vmem>>, vector<32x128xf32>
    %c0_1 = arith.constant 0 : index
    %c0_2 = arith.constant 0 : index
    %1 = vector.load %arg0[%c0_1, %c0_2] : memref<16x16xf32, #tpu.memory_space<vmem>>, vector<16x16xf32>
    %c0_3 = arith.constant 0 : index
    %c0_4 = arith.constant 0 : index
    %2 = vector.load %arg1[%c0_3, %c0_4] : memref<16x128xf32, #tpu.memory_space<vmem>>, vector<16x128xf32>
    %cst = arith.constant dense<0.000000e+00> : vector<16x128xf32>
    %3 = tpu.matmul %1, %2, %cst {dimension_numbers = #tpu.dot_dimension_numbers<[1], [0], [0], [1], [0, 0, 1, 1], [], []>} : vector<16x16xf32>, vector<16x128xf32>, vector<16x128xf32> -> vector<16x128xf32>
    %c0_5 = arith.constant 0 : index
    %c0_6 = arith.constant 0 : index
    %4 = vector.load %arg3[%c0_5, %c0_6] : memref<1x128xf32, #tpu.memory_space<vmem>>, vector<1x128xf32>
    %5 = vector.broadcast %4 : vector<1x128xf32> to vector<16x128xf32>
    %6 = arith.addf %3, %5 : vector<16x128xf32>
    %7 = vector.shape_cast %6 : vector<16x128xf32> to vector<8x2x128xf32>
    %cst_7 = arith.constant 0.000000e+00 : f32
    %8 = vector.broadcast %cst_7 : f32 to vector<2x32xf32>
    %cst_8 = arith.constant 0.000000e+00 : f32
    %9 = vector.broadcast %cst_8 : f32 to vector<2x32xf32>
    %10 = vector.extract_strided_slice %7 {offsets = [0, 0, 0], sizes = [1, 2, 128], strides = [1, 1, 1]} : vector<8x2x128xf32> to vector<1x2x128xf32>
    %11 = vector.shape_cast %10 : vector<1x2x128xf32> to vector<2x128xf32>
    %cst_9 = arith.constant dense<0.000000e+00> : vector<2x128xf32>
    %12 = tpu.matmul %8, %0, %cst_9 {dimension_numbers = #tpu.dot_dimension_numbers<[1], [0], [0], [1], [0, 0, 1, 1], [], []>} : vector<2x32xf32>, vector<32x128xf32>, vector<2x128xf32> -> vector<2x128xf32>
    %13 = arith.addf %11, %12 : vector<2x128xf32>
    %14 = arith.negf %13 : vector<2x128xf32>
    %15 = math.exp %14 : vector<2x128xf32>
    %cst_10 = arith.constant 1.000000e+00 : f32
    %16 = vector.broadcast %cst_10 : f32 to vector<2x128xf32>
    %17 = arith.addf %16, %15 : vector<2x128xf32>
    %18 = arith.divf %16, %17 : vector<2x128xf32>
    %19 = vector.extract_strided_slice %18 {offsets = [0, 0], sizes = [2, 32], strides = [1, 1]} : vector<2x128xf32> to vector<2x32xf32>
    %20 = vector.extract_strided_slice %18 {offsets = [0, 32], sizes = [2, 32], strides = [1, 1]} : vector<2x128xf32> to vector<2x32xf32>
    %21 = vector.extract_strided_slice %18 {offsets = [0, 64], sizes = [2, 32], strides = [1, 1]} : vector<2x128xf32> to vector<2x32xf32>
    %cst_11 = arith.constant 2.000000e+00 : f32
    %22 = vector.broadcast %cst_11 : f32 to vector<2x32xf32>
    %23 = arith.mulf %22, %21 : vector<2x32xf32>
    %cst_12 = arith.constant 1.000000e+00 : f32
    %24 = vector.broadcast %cst_12 : f32 to vector<2x32xf32>
    %25 = arith.subf %23, %24 : vector<2x32xf32>
    %26 = vector.extract_strided_slice %18 {offsets = [0, 96], sizes = [2, 32], strides = [1, 1]} : vector<2x128xf32> to vector<2x32xf32>
    %27 = arith.mulf %20, %9 : vector<2x32xf32>
    %28 = arith.mulf %19, %25 : vector<2x32xf32>
    %29 = arith.addf %27, %28 : vector<2x32xf32>
    %30 = math.tanh %29 : vector<2x32xf32>
    %31 = arith.mulf %26, %30 : vector<2x32xf32>
    %32 = vector.extract_strided_slice %7 {offsets = [1, 0, 0], sizes = [1, 2, 128], strides = [1, 1, 1]} : vector<8x2x128xf32> to vector<1x2x128xf32>
    %33 = vector.shape_cast %32 : vector<1x2x128xf32> to vector<2x128xf32>
    %cst_13 = arith.constant dense<0.000000e+00> : vector<2x128xf32>
    %34 = tpu.matmul %31, %0, %cst_13 {dimension_numbers = #tpu.dot_dimension_numbers<[1], [0], [0], [1], [0, 0, 1, 1], [], []>} : vector<2x32xf32>, vector<32x128xf32>, vector<2x128xf32> -> vector<2x128xf32>
    %35 = arith.addf %33, %34 : vector<2x128xf32>
    %36 = arith.negf %35 : vector<2x128xf32>
    %37 = math.exp %36 : vector<2x128xf32>
    %cst_14 = arith.constant 1.000000e+00 : f32
    %38 = vector.broadcast %cst_14 : f32 to vector<2x128xf32>
    %39 = arith.addf %38, %37 : vector<2x128xf32>
    %40 = arith.divf %38, %39 : vector<2x128xf32>
    %41 = vector.extract_strided_slice %40 {offsets = [0, 0], sizes = [2, 32], strides = [1, 1]} : vector<2x128xf32> to vector<2x32xf32>
    %42 = vector.extract_strided_slice %40 {offsets = [0, 32], sizes = [2, 32], strides = [1, 1]} : vector<2x128xf32> to vector<2x32xf32>
    %43 = vector.extract_strided_slice %40 {offsets = [0, 64], sizes = [2, 32], strides = [1, 1]} : vector<2x128xf32> to vector<2x32xf32>
    %cst_15 = arith.constant 2.000000e+00 : f32
    %44 = vector.broadcast %cst_15 : f32 to vector<2x32xf32>
    %45 = arith.mulf %44, %43 : vector<2x32xf32>
    %cst_16 = arith.constant 1.000000e+00 : f32
    %46 = vector.broadcast %cst_16 : f32 to vector<2x32xf32>
    %47 = arith.subf %45, %46 : vector<2x32xf32>
    %48 = vector.extract_strided_slice %40 {offsets = [0, 96], sizes = [2, 32], strides = [1, 1]} : vector<2x128xf32> to vector<2x32xf32>
    %49 = arith.mulf %42, %29 : vector<2x32xf32>
    %50 = arith.mulf %41, %47 : vector<2x32xf32>
    %51 = arith.addf %49, %50 : vector<2x32xf32>
    %52 = math.tanh %51 : vector<2x32xf32>
    %53 = arith.mulf %48, %52 : vector<2x32xf32>
    %54 = vector.extract_strided_slice %7 {offsets = [2, 0, 0], sizes = [1, 2, 128], strides = [1, 1, 1]} : vector<8x2x128xf32> to vector<1x2x128xf32>
    %55 = vector.shape_cast %54 : vector<1x2x128xf32> to vector<2x128xf32>
    %cst_17 = arith.constant dense<0.000000e+00> : vector<2x128xf32>
    %56 = tpu.matmul %53, %0, %cst_17 {dimension_numbers = #tpu.dot_dimension_numbers<[1], [0], [0], [1], [0, 0, 1, 1], [], []>} : vector<2x32xf32>, vector<32x128xf32>, vector<2x128xf32> -> vector<2x128xf32>
    %57 = arith.addf %55, %56 : vector<2x128xf32>
    %58 = arith.negf %57 : vector<2x128xf32>
    %59 = math.exp %58 : vector<2x128xf32>
    %cst_18 = arith.constant 1.000000e+00 : f32
    %60 = vector.broadcast %cst_18 : f32 to vector<2x128xf32>
    %61 = arith.addf %60, %59 : vector<2x128xf32>
    %62 = arith.divf %60, %61 : vector<2x128xf32>
    %63 = vector.extract_strided_slice %62 {offsets = [0, 0], sizes = [2, 32], strides = [1, 1]} : vector<2x128xf32> to vector<2x32xf32>
    %64 = vector.extract_strided_slice %62 {offsets = [0, 32], sizes = [2, 32], strides = [1, 1]} : vector<2x128xf32> to vector<2x32xf32>
    %65 = vector.extract_strided_slice %62 {offsets = [0, 64], sizes = [2, 32], strides = [1, 1]} : vector<2x128xf32> to vector<2x32xf32>
    %cst_19 = arith.constant 2.000000e+00 : f32
    %66 = vector.broadcast %cst_19 : f32 to vector<2x32xf32>
    %67 = arith.mulf %66, %65 : vector<2x32xf32>
    %cst_20 = arith.constant 1.000000e+00 : f32
    %68 = vector.broadcast %cst_20 : f32 to vector<2x32xf32>
    %69 = arith.subf %67, %68 : vector<2x32xf32>
    %70 = vector.extract_strided_slice %62 {offsets = [0, 96], sizes = [2, 32], strides = [1, 1]} : vector<2x128xf32> to vector<2x32xf32>
    %71 = arith.mulf %64, %51 : vector<2x32xf32>
    %72 = arith.mulf %63, %69 : vector<2x32xf32>
    %73 = arith.addf %71, %72 : vector<2x32xf32>
    %74 = math.tanh %73 : vector<2x32xf32>
    %75 = arith.mulf %70, %74 : vector<2x32xf32>
    %76 = vector.extract_strided_slice %7 {offsets = [3, 0, 0], sizes = [1, 2, 128], strides = [1, 1, 1]} : vector<8x2x128xf32> to vector<1x2x128xf32>
    %77 = vector.shape_cast %76 : vector<1x2x128xf32> to vector<2x128xf32>
    %cst_21 = arith.constant dense<0.000000e+00> : vector<2x128xf32>
    %78 = tpu.matmul %75, %0, %cst_21 {dimension_numbers = #tpu.dot_dimension_numbers<[1], [0], [0], [1], [0, 0, 1, 1], [], []>} : vector<2x32xf32>, vector<32x128xf32>, vector<2x128xf32> -> vector<2x128xf32>
    %79 = arith.addf %77, %78 : vector<2x128xf32>
    %80 = arith.negf %79 : vector<2x128xf32>
    %81 = math.exp %80 : vector<2x128xf32>
    %cst_22 = arith.constant 1.000000e+00 : f32
    %82 = vector.broadcast %cst_22 : f32 to vector<2x128xf32>
    %83 = arith.addf %82, %81 : vector<2x128xf32>
    %84 = arith.divf %82, %83 : vector<2x128xf32>
    %85 = vector.extract_strided_slice %84 {offsets = [0, 0], sizes = [2, 32], strides = [1, 1]} : vector<2x128xf32> to vector<2x32xf32>
    %86 = vector.extract_strided_slice %84 {offsets = [0, 32], sizes = [2, 32], strides = [1, 1]} : vector<2x128xf32> to vector<2x32xf32>
    %87 = vector.extract_strided_slice %84 {offsets = [0, 64], sizes = [2, 32], strides = [1, 1]} : vector<2x128xf32> to vector<2x32xf32>
    %cst_23 = arith.constant 2.000000e+00 : f32
    %88 = vector.broadcast %cst_23 : f32 to vector<2x32xf32>
    %89 = arith.mulf %88, %87 : vector<2x32xf32>
    %cst_24 = arith.constant 1.000000e+00 : f32
    %90 = vector.broadcast %cst_24 : f32 to vector<2x32xf32>
    %91 = arith.subf %89, %90 : vector<2x32xf32>
    %92 = vector.extract_strided_slice %84 {offsets = [0, 96], sizes = [2, 32], strides = [1, 1]} : vector<2x128xf32> to vector<2x32xf32>
    %93 = arith.mulf %86, %73 : vector<2x32xf32>
    %94 = arith.mulf %85, %91 : vector<2x32xf32>
    %95 = arith.addf %93, %94 : vector<2x32xf32>
    %96 = math.tanh %95 : vector<2x32xf32>
    %97 = arith.mulf %92, %96 : vector<2x32xf32>
    %98 = vector.extract_strided_slice %7 {offsets = [4, 0, 0], sizes = [1, 2, 128], strides = [1, 1, 1]} : vector<8x2x128xf32> to vector<1x2x128xf32>
    %99 = vector.shape_cast %98 : vector<1x2x128xf32> to vector<2x128xf32>
    %cst_25 = arith.constant dense<0.000000e+00> : vector<2x128xf32>
    %100 = tpu.matmul %97, %0, %cst_25 {dimension_numbers = #tpu.dot_dimension_numbers<[1], [0], [0], [1], [0, 0, 1, 1], [], []>} : vector<2x32xf32>, vector<32x128xf32>, vector<2x128xf32> -> vector<2x128xf32>
    %101 = arith.addf %99, %100 : vector<2x128xf32>
    %102 = arith.negf %101 : vector<2x128xf32>
    %103 = math.exp %102 : vector<2x128xf32>
    %cst_26 = arith.constant 1.000000e+00 : f32
    %104 = vector.broadcast %cst_26 : f32 to vector<2x128xf32>
    %105 = arith.addf %104, %103 : vector<2x128xf32>
    %106 = arith.divf %104, %105 : vector<2x128xf32>
    %107 = vector.extract_strided_slice %106 {offsets = [0, 0], sizes = [2, 32], strides = [1, 1]} : vector<2x128xf32> to vector<2x32xf32>
    %108 = vector.extract_strided_slice %106 {offsets = [0, 32], sizes = [2, 32], strides = [1, 1]} : vector<2x128xf32> to vector<2x32xf32>
    %109 = vector.extract_strided_slice %106 {offsets = [0, 64], sizes = [2, 32], strides = [1, 1]} : vector<2x128xf32> to vector<2x32xf32>
    %cst_27 = arith.constant 2.000000e+00 : f32
    %110 = vector.broadcast %cst_27 : f32 to vector<2x32xf32>
    %111 = arith.mulf %110, %109 : vector<2x32xf32>
    %cst_28 = arith.constant 1.000000e+00 : f32
    %112 = vector.broadcast %cst_28 : f32 to vector<2x32xf32>
    %113 = arith.subf %111, %112 : vector<2x32xf32>
    %114 = vector.extract_strided_slice %106 {offsets = [0, 96], sizes = [2, 32], strides = [1, 1]} : vector<2x128xf32> to vector<2x32xf32>
    %115 = arith.mulf %108, %95 : vector<2x32xf32>
    %116 = arith.mulf %107, %113 : vector<2x32xf32>
    %117 = arith.addf %115, %116 : vector<2x32xf32>
    %118 = math.tanh %117 : vector<2x32xf32>
    %119 = arith.mulf %114, %118 : vector<2x32xf32>
    %120 = vector.extract_strided_slice %7 {offsets = [5, 0, 0], sizes = [1, 2, 128], strides = [1, 1, 1]} : vector<8x2x128xf32> to vector<1x2x128xf32>
    %121 = vector.shape_cast %120 : vector<1x2x128xf32> to vector<2x128xf32>
    %cst_29 = arith.constant dense<0.000000e+00> : vector<2x128xf32>
    %122 = tpu.matmul %119, %0, %cst_29 {dimension_numbers = #tpu.dot_dimension_numbers<[1], [0], [0], [1], [0, 0, 1, 1], [], []>} : vector<2x32xf32>, vector<32x128xf32>, vector<2x128xf32> -> vector<2x128xf32>
    %123 = arith.addf %121, %122 : vector<2x128xf32>
    %124 = arith.negf %123 : vector<2x128xf32>
    %125 = math.exp %124 : vector<2x128xf32>
    %cst_30 = arith.constant 1.000000e+00 : f32
    %126 = vector.broadcast %cst_30 : f32 to vector<2x128xf32>
    %127 = arith.addf %126, %125 : vector<2x128xf32>
    %128 = arith.divf %126, %127 : vector<2x128xf32>
    %129 = vector.extract_strided_slice %128 {offsets = [0, 0], sizes = [2, 32], strides = [1, 1]} : vector<2x128xf32> to vector<2x32xf32>
    %130 = vector.extract_strided_slice %128 {offsets = [0, 32], sizes = [2, 32], strides = [1, 1]} : vector<2x128xf32> to vector<2x32xf32>
    %131 = vector.extract_strided_slice %128 {offsets = [0, 64], sizes = [2, 32], strides = [1, 1]} : vector<2x128xf32> to vector<2x32xf32>
    %cst_31 = arith.constant 2.000000e+00 : f32
    %132 = vector.broadcast %cst_31 : f32 to vector<2x32xf32>
    %133 = arith.mulf %132, %131 : vector<2x32xf32>
    %cst_32 = arith.constant 1.000000e+00 : f32
    %134 = vector.broadcast %cst_32 : f32 to vector<2x32xf32>
    %135 = arith.subf %133, %134 : vector<2x32xf32>
    %136 = vector.extract_strided_slice %128 {offsets = [0, 96], sizes = [2, 32], strides = [1, 1]} : vector<2x128xf32> to vector<2x32xf32>
    %137 = arith.mulf %130, %117 : vector<2x32xf32>
    %138 = arith.mulf %129, %135 : vector<2x32xf32>
    %139 = arith.addf %137, %138 : vector<2x32xf32>
    %140 = math.tanh %139 : vector<2x32xf32>
    %141 = arith.mulf %136, %140 : vector<2x32xf32>
    %142 = vector.extract_strided_slice %7 {offsets = [6, 0, 0], sizes = [1, 2, 128], strides = [1, 1, 1]} : vector<8x2x128xf32> to vector<1x2x128xf32>
    %143 = vector.shape_cast %142 : vector<1x2x128xf32> to vector<2x128xf32>
    %cst_33 = arith.constant dense<0.000000e+00> : vector<2x128xf32>
    %144 = tpu.matmul %141, %0, %cst_33 {dimension_numbers = #tpu.dot_dimension_numbers<[1], [0], [0], [1], [0, 0, 1, 1], [], []>} : vector<2x32xf32>, vector<32x128xf32>, vector<2x128xf32> -> vector<2x128xf32>
    %145 = arith.addf %143, %144 : vector<2x128xf32>
    %146 = arith.negf %145 : vector<2x128xf32>
    %147 = math.exp %146 : vector<2x128xf32>
    %cst_34 = arith.constant 1.000000e+00 : f32
    %148 = vector.broadcast %cst_34 : f32 to vector<2x128xf32>
    %149 = arith.addf %148, %147 : vector<2x128xf32>
    %150 = arith.divf %148, %149 : vector<2x128xf32>
    %151 = vector.extract_strided_slice %150 {offsets = [0, 0], sizes = [2, 32], strides = [1, 1]} : vector<2x128xf32> to vector<2x32xf32>
    %152 = vector.extract_strided_slice %150 {offsets = [0, 32], sizes = [2, 32], strides = [1, 1]} : vector<2x128xf32> to vector<2x32xf32>
    %153 = vector.extract_strided_slice %150 {offsets = [0, 64], sizes = [2, 32], strides = [1, 1]} : vector<2x128xf32> to vector<2x32xf32>
    %cst_35 = arith.constant 2.000000e+00 : f32
    %154 = vector.broadcast %cst_35 : f32 to vector<2x32xf32>
    %155 = arith.mulf %154, %153 : vector<2x32xf32>
    %cst_36 = arith.constant 1.000000e+00 : f32
    %156 = vector.broadcast %cst_36 : f32 to vector<2x32xf32>
    %157 = arith.subf %155, %156 : vector<2x32xf32>
    %158 = vector.extract_strided_slice %150 {offsets = [0, 96], sizes = [2, 32], strides = [1, 1]} : vector<2x128xf32> to vector<2x32xf32>
    %159 = arith.mulf %152, %139 : vector<2x32xf32>
    %160 = arith.mulf %151, %157 : vector<2x32xf32>
    %161 = arith.addf %159, %160 : vector<2x32xf32>
    %162 = math.tanh %161 : vector<2x32xf32>
    %163 = arith.mulf %158, %162 : vector<2x32xf32>
    %164 = vector.extract_strided_slice %7 {offsets = [7, 0, 0], sizes = [1, 2, 128], strides = [1, 1, 1]} : vector<8x2x128xf32> to vector<1x2x128xf32>
    %165 = vector.shape_cast %164 : vector<1x2x128xf32> to vector<2x128xf32>
    %cst_37 = arith.constant dense<0.000000e+00> : vector<2x128xf32>
    %166 = tpu.matmul %163, %0, %cst_37 {dimension_numbers = #tpu.dot_dimension_numbers<[1], [0], [0], [1], [0, 0, 1, 1], [], []>} : vector<2x32xf32>, vector<32x128xf32>, vector<2x128xf32> -> vector<2x128xf32>
    %167 = arith.addf %165, %166 : vector<2x128xf32>
    %168 = arith.negf %167 : vector<2x128xf32>
    %169 = math.exp %168 : vector<2x128xf32>
    %cst_38 = arith.constant 1.000000e+00 : f32
    %170 = vector.broadcast %cst_38 : f32 to vector<2x128xf32>
    %171 = arith.addf %170, %169 : vector<2x128xf32>
    %172 = arith.divf %170, %171 : vector<2x128xf32>
    %173 = vector.extract_strided_slice %172 {offsets = [0, 0], sizes = [2, 32], strides = [1, 1]} : vector<2x128xf32> to vector<2x32xf32>
    %174 = vector.extract_strided_slice %172 {offsets = [0, 32], sizes = [2, 32], strides = [1, 1]} : vector<2x128xf32> to vector<2x32xf32>
    %175 = vector.extract_strided_slice %172 {offsets = [0, 64], sizes = [2, 32], strides = [1, 1]} : vector<2x128xf32> to vector<2x32xf32>
    %cst_39 = arith.constant 2.000000e+00 : f32
    %176 = vector.broadcast %cst_39 : f32 to vector<2x32xf32>
    %177 = arith.mulf %176, %175 : vector<2x32xf32>
    %cst_40 = arith.constant 1.000000e+00 : f32
    %178 = vector.broadcast %cst_40 : f32 to vector<2x32xf32>
    %179 = arith.subf %177, %178 : vector<2x32xf32>
    %180 = vector.extract_strided_slice %172 {offsets = [0, 96], sizes = [2, 32], strides = [1, 1]} : vector<2x128xf32> to vector<2x32xf32>
    %181 = arith.mulf %174, %161 : vector<2x32xf32>
    %182 = arith.mulf %173, %179 : vector<2x32xf32>
    %183 = arith.addf %181, %182 : vector<2x32xf32>
    %184 = math.tanh %183 : vector<2x32xf32>
    %185 = arith.mulf %180, %184 : vector<2x32xf32>
    %c0_41 = arith.constant 0 : index
    %c0_42 = arith.constant 0 : index
    %186 = vector.load %arg5[%c0_41, %c0_42] : memref<32x32xf32, #tpu.memory_space<vmem>>, vector<32x32xf32>
    %cst_43 = arith.constant dense<0.000000e+00> : vector<2x32xf32>
    %187 = tpu.matmul %185, %186, %cst_43 {dimension_numbers = #tpu.dot_dimension_numbers<[1], [0], [0], [1], [0, 0, 1, 1], [], []>} : vector<2x32xf32>, vector<32x32xf32>, vector<2x32xf32> -> vector<2x32xf32>
    %c0_44 = arith.constant 0 : index
    %c0_45 = arith.constant 0 : index
    %188 = vector.load %arg7[%c0_44, %c0_45] : memref<1x32xf32, #tpu.memory_space<vmem>>, vector<1x32xf32>
    %189 = vector.broadcast %188 : vector<1x32xf32> to vector<2x32xf32>
    %190 = arith.addf %187, %189 : vector<2x32xf32>
    %c0_46 = arith.constant 0 : index
    %c0_47 = arith.constant 0 : index
    %191 = vector.load %arg4[%c0_46, %c0_47] : memref<10x8xf32, #tpu.memory_space<vmem>>, vector<10x8xf32>
    %c0_48 = arith.constant 0 : index
    %c0_49 = arith.constant 0 : index
    %192 = vector.load %arg6[%c0_48, %c0_49] : memref<8x32xf32, #tpu.memory_space<vmem>>, vector<8x32xf32>
    %cst_50 = arith.constant dense<0.000000e+00> : vector<10x32xf32>
    %193 = tpu.matmul %191, %192, %cst_50 {dimension_numbers = #tpu.dot_dimension_numbers<[1], [0], [0], [1], [0, 0, 1, 1], [], []>} : vector<10x8xf32>, vector<8x32xf32>, vector<10x32xf32> -> vector<10x32xf32>
    %194 = vector.shape_cast %193 : vector<10x32xf32> to vector<2x5x32xf32>
    %195 = vector.shape_cast %190 : vector<2x32xf32> to vector<2x1x32xf32>
    %196 = vector.broadcast %195 : vector<2x1x32xf32> to vector<2x5x32xf32>
    %197 = arith.addf %194, %196 : vector<2x5x32xf32>
    %cst_51 = arith.constant 0.00999999977 : f32
    %198 = vector.broadcast %cst_51 : f32 to vector<2x5x32xf32>
    %199 = arith.mulf %198, %197 : vector<2x5x32xf32>
    %200 = arith.maximumf %197, %199 : vector<2x5x32xf32>
    %201 = vector.shape_cast %200 : vector<2x5x32xf32> to vector<10x32xf32>
    %c0_52 = arith.constant 0 : index
    %c0_53 = arith.constant 0 : index
    %202 = vector.load %arg8[%c0_52, %c0_53] : memref<32x32xf32, #tpu.memory_space<vmem>>, vector<32x32xf32>
    %cst_54 = arith.constant dense<0.000000e+00> : vector<10x32xf32>
    %203 = tpu.matmul %201, %202, %cst_54 {dimension_numbers = #tpu.dot_dimension_numbers<[1], [0], [0], [1], [0, 0, 1, 1], [], []>} : vector<10x32xf32>, vector<32x32xf32>, vector<10x32xf32> -> vector<10x32xf32>
    %c0_55 = arith.constant 0 : index
    %c0_56 = arith.constant 0 : index
    %204 = vector.load %arg9[%c0_55, %c0_56] : memref<1x32xf32, #tpu.memory_space<vmem>>, vector<1x32xf32>
    %205 = vector.broadcast %204 : vector<1x32xf32> to vector<10x32xf32>
    %206 = arith.addf %203, %205 : vector<10x32xf32>
    %cst_57 = arith.constant 0.00999999977 : f32
    %207 = vector.broadcast %cst_57 : f32 to vector<10x32xf32>
    %208 = arith.mulf %207, %206 : vector<10x32xf32>
    %209 = arith.maximumf %206, %208 : vector<10x32xf32>
    %210 = vector.shape_cast %209 : vector<10x32xf32> to vector<2x5x32xf32>
    %c0_58 = arith.constant 0 : index
    %c0_59 = arith.constant 0 : index
    %211 = vector.load %arg10[%c0_58, %c0_59] : memref<1x32xf32, #tpu.memory_space<vmem>>, vector<1x32xf32>
    %212 = vector.shape_cast %211 : vector<1x32xf32> to vector<1x1x32xf32>
    %213 = vector.broadcast %212 : vector<1x1x32xf32> to vector<2x5x32xf32>
    %214 = arith.mulf %210, %213 : vector<2x5x32xf32>
    %cst_60 = arith.constant dense<0.000000e+00> : vector<2x5xf32>
    %215 = vector.multi_reduction <add>, %214, %cst_60 [2] : vector<2x5x32xf32> to vector<2x5xf32>
    %c0_61 = arith.constant 0 : index
    %216 = memref.load %arg11[%c0_61] : memref<1xf32, #tpu.memory_space<smem>>
    %217 = vector.broadcast %216 : f32 to vector<2x5xf32>
    %218 = arith.addf %215, %217 : vector<2x5xf32>
    %219 = math.tanh %218 : vector<2x5xf32>
    %c0_62 = arith.constant 0 : index
    %c0_63 = arith.constant 0 : index
    %220 = vector.load %arg12[%c0_62, %c0_63] : memref<2x5xf32, #tpu.memory_space<vmem>>, vector<2x5xf32>
    tpu.vector_store %arg12[%c0_62, %c0_63], %219 {strides = array<i32>} : memref<2x5xf32, #tpu.memory_space<vmem>>, vector<2x5xf32>,
    return
  }
}

</mosaic_0001>

<bundles_post_ra>
// kernel: tpu_custom_call.1
= control target key start
LH: loop header
LB: loop body
LE: loop exit
PB: predicated region body
PF: predicated region fallthrough
CT: control target
= control target key end

     0   :  { %18 = vsyncpa [#allocation4], 0  ;;  %s2807_s0 = inlined_call_operand.hbm [shape: f32[16,16], index: 0, kind: input, shape index: {}]   ;;  %s2808_s1 = inlined_call_operand.hbm [shape: f32[16,128], index: 1, kind: input, shape index: {}]   ;;  %s2809_s2 = inlined_call_operand.vmem [shape: f32[32,128], index: 2, kind: input, shape index: {}]   ;;  %s2810_s3 = inlined_call_operand.vmem [shape: f32[1,128], index: 3, kind: input, shape index: {}]   ;;  %s2811_s4 = inlined_call_operand.vmem [shape: f32[10,8], index: 4, kind: input, shape index: {}]   ;;  %s2812_s5 = inlined_call_operand.hbm [shape: f32[32,32], index: 5, kind: input, shape index: {}]   ;;  %s2813_s6 = inlined_call_operand.vmem [shape: f32[8,32], index: 6, kind: input, shape index: {}]   ;;  %s2814_s7 = inlined_call_operand.vmem [shape: f32[1,32], index: 7, kind: input, shape index: {}]   ;;  %s2815_s8 = inlined_call_operand.hbm [shape: f32[32,32], index: 8, kind: input, shape index: {}]   ;;  %s2816_s9 = inlined_call_operand.vmem [shape: f32[1,32], index: 9, kind: input, shape index: {}]   ;;  %s2817_s10 = inlined_call_operand.vmem [shape: f32[1,32], index: 10, kind: input, shape index: {}]   ;;  %s2818_s11 = inlined_call_operand.<no memory space> [shape: f32[1], index: 11, kind: input, shape index: {}]   ;;  %s2819_s12 = inlined_call_operand.hbm [shape: f32[2,5], index: 12, kind: output, shape index: {}]  }
   0x1   :  { %19 = vsyncpa [#allocation7], 0 }
   0x2   :  { %20 = vsyncpa [#allocation10], 0 }
   0x3   :  { %21 = vsyncpa [#allocation5], 0  ;;  %s2417_s21 = smov [#allocation6]   ;;  %s2418_s23 = smov [#allocation3]  }
   0x4   :  { %s39_s22 = sshll.u32 %s2417_s21, 4  ;;  %s27_s24 = sshll.u32 %s2418_s23, 4  ;;  %s40_s22 = int_to_ptr.vmem [resolvable:$true] %s39_s22  ;;  %s2496_s24 = int_to_ptr.vmem [resolvable:$true] %s27_s24 }
   0x5   :  { %s2299_s27 = scalar_lea.hbm %s2808_s1, 256 }
   0x6   :  { %p2300_p0 = scmp.ne.s32.totalorder %s2808_s1, %s2299_s27  ;;  %p2303_p1 = scmp.lt.u32.totalorder %s2299_s27, %s2808_s1 }
   0x8   :  { %p2305_p2 = pnand %p2303_p1, %p2300_p0 }
   0xa   :  { %2308 = shalt.err (!%p2305_p2)
}
   0xb   :  { %s2309_s14 = scalar_lea.vmem %s40_s22, 256  ;;  %p2314_p4 = scmp.lt.s32.totalorder %s40_s22, %s40_s22 }
   0xc   :  { %p2310_p3 = scmp.ne.s32.totalorder %s40_s22, %s2309_s14  ;;  %p2315_p5 = scmp.lt.s32.totalorder %s2309_s14, %s2309_s14 }
   0xe   :  { %p2316_p6 = por %p2315_p5, %p2314_p4 }
  0x10   :  { %p2317_p7 = pnand %p2316_p6, %p2310_p3 }
  0x12   :  { %2320 = shalt.err (!%p2317_p7)
}
  0x13   :  { %s2419_s15 = smov 128   ;;  %s2420_s16 = smov 8  }
  0x14   :  { %45 = dma.hbm_to_vmem [thread:$0]  %s2808_s1, 256, %s40_s22, [#allocation7], %s2419_s15, %s2419_s15, %s2420_s16  }
  0x15   :  { %s2321_s21 = scalar_lea.hbm %s2807_s0, 256 }
  0x16   :  { %p2322_p8 = scmp.ne.s32.totalorder %s2807_s0, %s2321_s21  ;;  %p2325_p9 = scmp.lt.u32.totalorder %s2321_s21, %s2807_s0 }
  0x18   :  { %p2327_p10 = pnand %p2325_p9, %p2322_p8 }
  0x1a   :  { %2330 = shalt.err (!%p2327_p10)
}
  0x1b   :  { %s2331_s28 = scalar_lea.vmem %s2496_s24, 256  ;;  %p2336_p12 = scmp.lt.s32.totalorder %s2496_s24, %s2496_s24 }
  0x1c   :  { %p2332_p11 = scmp.ne.s32.totalorder %s2496_s24, %s2331_s28  ;;  %p2337_p13 = scmp.lt.s32.totalorder %s2331_s28, %s2331_s28 }
  0x1e   :  { %p2338_p0 = por %p2337_p13, %p2336_p12 }
  0x20   :  { %p2339_p1 = pnand %p2338_p0, %p2332_p11 }
  0x22   :  { %2342 = shalt.err (!%p2339_p1)
}
  0x23   :  { %33 = dma.hbm_to_vmem [thread:$0]  %s2807_s0, 256, %s2496_s24, [#allocation4], %s2419_s15, %s2419_s15, %s2420_s16  }
  0x24   :  { %s2421_s29 = smov [#allocation8]   ;;  %s2422_s13 = smov [#allocation9]  }
  0x25   :  { %s57_s30 = sshll.u32 %s2421_s29, 4  ;;  %s73_s14 = sshll.u32 %s2422_s13, 4  ;;  %s58_s30 = int_to_ptr.vmem [resolvable:$true] %s57_s30  ;;  %s2533_s14 = int_to_ptr.vmem [resolvable:$true] %s73_s14 }
  0x26   :  { %s2343_s19 = scalar_lea.hbm %s2812_s5, 512 }
  0x27   :  { %p2344_p2 = scmp.ne.s32.totalorder %s2812_s5, %s2343_s19  ;;  %p2347_p3 = scmp.lt.u32.totalorder %s2343_s19, %s2812_s5 }
  0x29   :  { %p2349_p4 = pnand %p2347_p3, %p2344_p2 }
  0x2b   :  { %2352 = shalt.err (!%p2349_p4)
}
  0x2c   :  { %s2353_s0 = scalar_lea.vmem %s58_s30, 512  ;;  %p2358_p6 = scmp.lt.s32.totalorder %s58_s30, %s58_s30 }
  0x2d   :  { %p2354_p5 = scmp.ne.s32.totalorder %s58_s30, %s2353_s0  ;;  %p2359_p7 = scmp.lt.s32.totalorder %s2353_s0, %s2353_s0 }
  0x2f   :  { %p2360_p8 = por %p2359_p7, %p2358_p6 }
  0x31   :  { %p2361_p9 = pnand %p2360_p8, %p2354_p5 }
  0x33   :  { %2364 = shalt.err (!%p2361_p9)
}
  0x34   :  { %63 = dma.hbm_to_vmem [thread:$0]  %s2812_s5, 512, %s58_s30, [#allocation7], %s2419_s15, %s2419_s15, %s2420_s16  }
  0x35   :  { %s2365_s1 = scalar_lea.hbm %s2815_s8, 512 }
  0x36   :  { %p2366_p10 = scmp.ne.s32.totalorder %s2815_s8, %s2365_s1  ;;  %p2369_p11 = scmp.lt.u32.totalorder %s2365_s1, %s2815_s8 }
  0x38   :  { %p2371_p12 = pnand %p2369_p11, %p2366_p10 }
  0x3a   :  { %2374 = shalt.err (!%p2371_p12)
}
  0x3b   :  { %s2375_s18 = scalar_lea.vmem %s2533_s14, 512  ;;  %p2380_p0 = scmp.lt.s32.totalorder %s2533_s14, %s2533_s14 }
  0x3c   :  { %p2376_p13 = scmp.ne.s32.totalorder %s2533_s14, %s2375_s18  ;;  %p2381_p1 = scmp.lt.s32.totalorder %s2375_s18, %s2375_s18 }
  0x3e   :  { %p2382_p2 = por %p2381_p1, %p2380_p0 }
  0x40   :  { %p2383_p3 = pnand %p2382_p2, %p2376_p13 }
  0x42   :  { %2386 = shalt.err (!%p2383_p3)
}
  0x43   :  { %79 = dma.hbm_to_vmem [thread:$0]  %s2815_s8, 512, %s2533_s14, [#allocation10], %s2419_s15, %s2419_s15, %s2420_s16  }
  0x44   :  { %2409 = dma.done.wait [#allocation4], 256  }
  0x45   :  { %2410 = vsyncadd [#allocation4], 4294967040 }
  0x46   :  { %2411 = dma.done.wait [#allocation7], 768  }
  0x47   :  { %2412 = vsyncadd [#allocation7], 4294966528 }
  0x48   :  { %2413 = dma.done.wait [#allocation10], 512  }
  0x49   :  { %2414 = vsyncadd [#allocation10], 4294966784  ;;  %v2423_v0 = vmov 0.0|0.0   ;;  %vm2424_vm0 = vmmov 0   ;;  %v2425_v1 = vmov 0.0   ;;  %vm113_vm1 = vcmask 130048  }
  0x4a   :  { %2177 = vmatprep.subr.bf16.mxu0 %v2423_v0  ;;  %2071 = vmatprep.mubr.msk.f32.mxu0 %vm2424_vm0, %v2425_v1  ;;  %v104_v2 = vld [vmem:[#allocation6] sm:$0xff]  ;;  %v105_v3 = vld [vmem:[#allocation6 + $0x8] sm:$0xff]  ;;  %v102_v4 = vld [vmem:[#allocation3] sm:$0xff]  ;;  %v2426_v13 = vmov 1983009808   ;;  %v201_v15 = vlaneseq  ;;  %s2428_s0 = smov 32  }
  0x4b   :  { %v2167_v5 = vpack.c.bf16 %v105_v3, %v104_v2  ;;  %2049 = vmatprep.mubr.msk.f32.mxu1 %vm113_vm1, %v102_v4  ;;  %v98_v6 = vld [vmem:[%s2809_s2] sm:$0xff]  ;;  %v99_v7 = vld [vmem:[%s2809_s2 + $0x8] sm:$0xff]  ;;  %v100_v10 = vld [vmem:[%s2809_s2 + $0x10] sm:$0xff]  ;;  %v199_v14 = vunpack.c.l.s4 %v2426_v13  ;;  %vm239_vm2 = vcmask 261120   ;;  %vm1191_vm3 = vcmask 64512   ;;  %s2430_s18 = smov [#allocation11]  }
  0x4c   :  { %v2580_v8 = vpack.c.bf16 %v99_v7, %v98_v6  ;;  %v103_v9 = vld [vmem:[#allocation3 + $0x8] sm:$0xff]  ;;  %v101_v11 = vld [vmem:[%s2809_s2 + $0x18] sm:$0xff]  ;;  %v1953_v16 = vld [vmem:[%s2810_s3] ss:$0 sm:$0xff]  ;;  %v2613_v18 = vshrl.u32 %v201_v15, 7  ;;  %s2427_s3 = smov 64  }
  0x4d   :  { %2168 = vmatprep.subr.bf16.mxu1 %v2167_v5  ;;  %v2592_v12 = vpack.c.bf16 %v101_v11, %v100_v10  ;;  %v200_v17 = vunpack.c.0.s8 %v199_v14  ;;  %vm1906_vm4 = vcmask 258048   ;;  %s1942_s5 = sshll.u32 %s2430_s18, 4  ;;  %vm1931_vm5 = vcmask 1041409   ;;  %s1943_s5 = int_to_ptr.vmem [resolvable:$true] %s1942_s5 }
  0x4e   :  { %2170 = vmatpush3.bf16.msra.mxu1 %v2167_v5  ;;  %2179 = vmatpush3.bf16.msra.mxu0 %v2580_v8  ;;  %vm1934_vm6 = vcmask 33792   ;;  %p2392_p5 = scmp.lt.s32.totalorder %s1943_s5, %s1943_s5 }
  0x4f   :  { %2171 = vmatprep.subr.bf16.mxu1 %v2423_v0  ;;  %2180 = vmatprep.subr.bf16.mxu0 %v2423_v0  ;;  %v2620_v23 = vsub.s32 %v200_v17, %v2613_v18 }
  0x51   :  { %2050 = vmatmul.mubr.msk.f32.vlgmr.msra.gmra.mrb[0].mxu1 %vm113_vm1, %v103_v9 }
  0x52   :  { %2173 = vmatpush3.bf16.msra.mxu1 %v2580_v8  ;;  %2060 = vmatprep.mubr.msk.f32.mxu1 %vm2424_vm0, %v2425_v1 }
  0x53   :  { %2174 = vmatprep.subr.bf16.mxu1 %v2423_v0  ;;  %2182 = vmatpush3.bf16.msra.mxu0 %v2592_v12 }
  0x54   :  { %2189 = vmatprep.subr.bf16.mxu0 %v2423_v0 }
  0x56   :  { %2176 = vmatpush3.bf16.msra.mxu1 %v2592_v12 }
  0x57   :  { %2183 = vmatprep.subr.bf16.mxu1 %v2423_v0 }
  0x59   :  { %2061 = vmatmul.mubr.f32.vlgmr.msra.gmra.mrb[2].mxu1 %v2425_v1 }
  0x5a   :  { %2185 = vmatpush3.bf16.msra.mxu1 %v2580_v8  ;;  %2082 = vmatprep.mubr.msk.f32.mxu1 %vm2424_vm0, %v2425_v1 }
  0x5b   :  { %2186 = vmatprep.subr.bf16.mxu1 %v2423_v0 }
  0x5e   :  { %2188 = vmatpush3.bf16.msra.mxu1 %v2592_v12 }
  0x5f   :  { %2195 = vmatprep.subr.bf16.mxu1 %v2423_v0 }
 0x124   :  { %v2051_v19 = vpop.f32.mrb[0].mxu1 }
 0x125   :  { %v2615_v20 = vadd.f32 %v2051_v19, %v1953_v16  ;;  %v186_v21 = vpop.f32.mrb[1].mxu1 }
 0x126   :  { %v2617_v22 = vadd.f32 %v1953_v16, %v186_v21 }
 0x128   :  { %v204_v24 = vrot.slane %v2617_v22, %v2620_v23  ;;  %v197_v2 = vcombine.high %v2617_v22, %v2617_v22 }
 0x12a   :  { %v212_v44 = vcombine.high %v204_v24, %v204_v24  ;;  %v211_v3 = vrot.slane %v197_v2, %v2620_v23 }
 0x12c   :  { %v309_v25 = vpop.f32.mrb[2].mxu1 }
 0x12d   :  { %v313_v26 = vadd.f32 %v309_v25, %v204_v24  ;;  %v2062_v27 = vpop.f32.mrb[3].mxu1 }
 0x12f   :  { %v1956_v28 = vmul.f32 -1.442695, %v313_v26 }
 0x131   :  { %2247 = vpow2.f32 %v1956_v28 }
 0x13b   :  { %v2248_v29 = vpop.eup %2247 }
 0x13c   :  { %v317_v30 = vadd.f32 1.0, %v2248_v29  ;;  %v213_v29 = vcombine.high %v211_v3, %v211_v3 }
 0x13e   :  { %2249 = vrcp.f32 %v317_v30 }
 0x148   :  { %v2250_v31 = vpop.eup %2249 }
 0x149   :  { %v320_v32 = vmul.f32 2.0, %v2250_v31  ;;  %v322_v36 = vmul.f32 0.0, %v2250_v31 }
 0x14b   :  { %v1957_v33 = vadd.f32 -1.0, %v320_v32 }
 0x14d   :  { %324 = vrot.lane.b32.xlu0 %v1957_v33, %s2427_s3 }
 0x1bf   :  { %v325_v34 = vpop.permute.xlu0 %324 }
 0x1c0   :  { %v327_v35 = vmul.f32 %v2250_v31, %v325_v34 }
 0x1c2   :  { %329 = vrot.lane.b32.xlu0 %v327_v35, %s2428_s0 }
 0x234   :  { %v330_v37 = vpop.permute.xlu0 %329 }
 0x235   :  { %v332_v38 = vadd.f32 %v330_v37, %v322_v36 }
 0x237   :  { %2251 = vtanh.f32 %v332_v38 }
 0x241   :  { %v2252_v39 = vpop.eup %2251 }
 0x242   :  { %335 = vrot.lane.b32.xlu1 %v2252_v39, %s2427_s3 }
 0x2b4   :  { %v336_v40 = vpop.permute.xlu1 %335 }
 0x2b5   :  { %v338_v41 = vmul.f32 %v2250_v31, %v336_v40 }
 0x2b7   :  { %v346_v42 = vrot.slane %v338_v41, %v2620_v23 }
 0x2b9   :  { %347 = vrot.lane.b32.xlu1 %v346_v42, %s2428_s0 }
 0x32b   :  { %v348_v43 = vpop.permute.xlu1 %347 }
 0x32c   :  { %2072 = vmatmul.mubr.msk.f32.vlgmr.msra.gmra.mrb[0].mxu0 %vm239_vm2, %v348_v43 }
 0x32d   :  { %2191 = vmatpush3.bf16.msra.mxu0 %v2580_v8  ;;  %2093 = vmatprep.mubr.msk.f32.mxu0 %vm2424_vm0, %v2425_v1 }
 0x32e   :  { %2192 = vmatprep.subr.bf16.mxu0 %v2423_v0 }
 0x331   :  { %2194 = vmatpush3.bf16.msra.mxu0 %v2592_v12 }
 0x332   :  { %2201 = vmatprep.subr.bf16.mxu0 %v2423_v0 }
 0x3ff   :  { %v417_v45 = vpop.f32.mrb[0].mxu0 }
 0x400   :  { %v421_v46 = vadd.f32 %v417_v45, %v212_v44  ;;  %v2073_v47 = vpop.f32.mrb[1].mxu0 }
 0x402   :  { %v1959_v48 = vmul.f32 -1.442695, %v421_v46 }
 0x404   :  { %2253 = vpow2.f32 %v1959_v48 }
 0x40e   :  { %v2254_v49 = vpop.eup %2253 }
 0x40f   :  { %v425_v50 = vadd.f32 1.0, %v2254_v49  ;;  %v221_v49 = vrot.slane %v2615_v20, %v2620_v23 }
 0x411   :  { %2255 = vrcp.f32 %v425_v50 }
 0x41b   :  { %v2256_v51 = vpop.eup %2255 }
 0x41c   :  { %v428_v52 = vmul.f32 2.0, %v2256_v51  ;;  %v430_v56 = vmul.f32 %v2256_v51, %v332_v38 }
 0x41e   :  { %v1960_v53 = vadd.f32 -1.0, %v428_v52 }
 0x420   :  { %432 = vrot.lane.b32.xlu0 %v1960_v53, %s2427_s3 }
 0x492   :  { %v433_v54 = vpop.permute.xlu0 %432 }
 0x493   :  { %v435_v55 = vmul.f32 %v2256_v51, %v433_v54 }
 0x495   :  { %437 = vrot.lane.b32.xlu1 %v435_v55, %s2428_s0 }
 0x507   :  { %v438_v57 = vpop.permute.xlu1 %437 }
 0x508   :  { %v440_v58 = vadd.f32 %v438_v57, %v430_v56 }
 0x50a   :  { %2257 = vtanh.f32 %v440_v58 }
 0x514   :  { %v2258_v59 = vpop.eup %2257 }
 0x515   :  { %443 = vrot.lane.b32.xlu0 %v2258_v59, %s2427_s3 }
 0x587   :  { %v444_v60 = vpop.permute.xlu0 %443 }
 0x588   :  { %v446_v61 = vmul.f32 %v2256_v51, %v444_v60 }
 0x58a   :  { %v454_v62 = vrot.slane %v446_v61, %v2620_v23 }
 0x58c   :  { %455 = vrot.lane.b32.xlu1 %v454_v62, %s2428_s0 }
 0x5fe   :  { %v456_v63 = vpop.permute.xlu1 %455 }
 0x5ff   :  { %2083 = vmatmul.mubr.msk.f32.vlgmr.msra.gmra.mrb[4].mxu1 %vm239_vm2, %v456_v63 }
 0x600   :  { %2197 = vmatpush3.bf16.msra.mxu1 %v2580_v8  ;;  %2104 = vmatprep.mubr.msk.f32.mxu1 %vm2424_vm0, %v2425_v1 }
 0x601   :  { %2198 = vmatprep.subr.bf16.mxu1 %v2423_v0 }
 0x604   :  { %2200 = vmatpush3.bf16.msra.mxu1 %v2592_v12 }
 0x605   :  { %2207 = vmatprep.subr.bf16.mxu1 %v2423_v0 }
 0x6d2   :  { %v525_v4 = vpop.f32.mrb[4].mxu1 }
 0x6d3   :  { %v529_v5 = vadd.f32 %v525_v4, %v211_v3  ;;  %v2084_v6 = vpop.f32.mrb[5].mxu1 }
 0x6d5   :  { %v1962_v7 = vmul.f32 -1.442695, %v529_v5 }
 0x6d7   :  { %2259 = vpow2.f32 %v1962_v7  ;;  %v229_v7 = vcombine.high %v221_v49, %v221_v49 }
 0x6e1   :  { %v2260_v9 = vpop.eup %2259 }
 0x6e2   :  { %v533_v10 = vadd.f32 1.0, %v2260_v9 }
 0x6e4   :  { %2261 = vrcp.f32 %v533_v10 }
 0x6ee   :  { %v2262_v11 = vpop.eup %2261 }
 0x6ef   :  { %v536_v13 = vmul.f32 2.0, %v2262_v11  ;;  %v538_v19 = vmul.f32 %v2262_v11, %v440_v58 }
 0x6f1   :  { %v1963_v14 = vadd.f32 -1.0, %v536_v13 }
 0x6f3   :  { %540 = vrot.lane.b32.xlu0 %v1963_v14, %s2427_s3 }
 0x765   :  { %v541_v16 = vpop.permute.xlu0 %540 }
 0x766   :  { %v543_v17 = vmul.f32 %v2262_v11, %v541_v16 }
 0x768   :  { %545 = vrot.lane.b32.xlu1 %v543_v17, %s2428_s0 }
 0x7da   :  { %v546_v21 = vpop.permute.xlu1 %545 }
 0x7db   :  { %v548_v22 = vadd.f32 %v546_v21, %v538_v19 }
 0x7dd   :  { %2263 = vtanh.f32 %v548_v22 }
 0x7e7   :  { %v2264_v24 = vpop.eup %2263 }
 0x7e8   :  { %551 = vrot.lane.b32.xlu0 %v2264_v24, %s2427_s3 }
 0x85a   :  { %v552_v25 = vpop.permute.xlu0 %551 }
 0x85b   :  { %v554_v26 = vmul.f32 %v2262_v11, %v552_v25 }
 0x85d   :  { %v562_v27 = vrot.slane %v554_v26, %v2620_v23 }
 0x85f   :  { %563 = vrot.lane.b32.xlu1 %v562_v27, %s2428_s0 }
 0x8d1   :  { %v564_v28 = vpop.permute.xlu1 %563 }
 0x8d2   :  { %2094 = vmatmul.mubr.msk.f32.vlgmr.msra.gmra.mrb[2].mxu0 %vm239_vm2, %v564_v28 }
 0x8d3   :  { %2203 = vmatpush3.bf16.msra.mxu0 %v2580_v8  ;;  %2115 = vmatprep.mubr.msk.f32.mxu0 %vm2424_vm0, %v2425_v1 }
 0x8d4   :  { %2204 = vmatprep.subr.bf16.mxu0 %v2423_v0 }
 0x8d7   :  { %2206 = vmatpush3.bf16.msra.mxu0 %v2592_v12 }
 0x8d8   :  { %2213 = vmatprep.subr.bf16.mxu0 %v2423_v0 }
 0x9a5   :  { %v633_v30 = vpop.f32.mrb[2].mxu0 }
 0x9a6   :  { %v637_v31 = vadd.f32 %v633_v30, %v213_v29  ;;  %v2095_v32 = vpop.f32.mrb[3].mxu0 }
 0x9a8   :  { %v1965_v33 = vmul.f32 -1.442695, %v637_v31  ;;  %v214_v31 = vcombine.high %v2615_v20, %v2615_v20 }
 0x9aa   :  { %2265 = vpow2.f32 %v1965_v33  ;;  %v228_v32 = vrot.slane %v214_v31, %v2620_v23  ;;  %v1979_v31 = vld [vmem:[%s2814_s7] ss:$0 sm:$0xff] }
 0x9b4   :  { %v2266_v34 = vpop.eup %2265 }
 0x9b5   :  { %v641_v35 = vadd.f32 1.0, %v2266_v34 }
 0x9b7   :  { %2267 = vrcp.f32 %v641_v35 }
 0x9c1   :  { %v2268_v36 = vpop.eup %2267 }
 0x9c2   :  { %v644_v37 = vmul.f32 2.0, %v2268_v36  ;;  %v646_v41 = vmul.f32 %v2268_v36, %v548_v22 }
 0x9c4   :  { %v1966_v38 = vadd.f32 -1.0, %v644_v37 }
 0x9c6   :  { %648 = vrot.lane.b32.xlu0 %v1966_v38, %s2427_s3 }
 0xa38   :  { %v649_v39 = vpop.permute.xlu0 %648 }
 0xa39   :  { %v651_v40 = vmul.f32 %v2268_v36, %v649_v39 }
 0xa3b   :  { %653 = vrot.lane.b32.xlu1 %v651_v40, %s2428_s0 }
 0xaad   :  { %v654_v42 = vpop.permute.xlu1 %653 }
 0xaae   :  { %v656_v43 = vadd.f32 %v654_v42, %v646_v41 }
 0xab0   :  { %2269 = vtanh.f32 %v656_v43 }
 0xaba   :  { %v2270_v44 = vpop.eup %2269 }
 0xabb   :  { %659 = vrot.lane.b32.xlu0 %v2270_v44, %s2427_s3 }
 0xb2d   :  { %v660_v45 = vpop.permute.xlu0 %659 }
 0xb2e   :  { %v662_v46 = vmul.f32 %v2268_v36, %v660_v45 }
 0xb30   :  { %v670_v47 = vrot.slane %v662_v46, %v2620_v23 }
 0xb32   :  { %671 = vrot.lane.b32.xlu1 %v670_v47, %s2428_s0 }
 0xba4   :  { %v672_v48 = vpop.permute.xlu1 %671 }
 0xba5   :  { %2105 = vmatmul.mubr.msk.f32.vlgmr.msra.gmra.mrb[6].mxu1 %vm239_vm2, %v672_v48 }
 0xba6   :  { %2209 = vmatpush3.bf16.msra.mxu1 %v2580_v8  ;;  %2126 = vmatprep.mubr.msk.f32.mxu1 %vm2424_vm0, %v2425_v1 }
 0xba7   :  { %2210 = vmatprep.subr.bf16.mxu1 %v2423_v0 }
 0xbaa   :  { %2212 = vmatpush3.bf16.msra.mxu1 %v2592_v12 }
 0xbab   :  { %2219 = vmatprep.subr.bf16.mxu1 %v2423_v0 }
 0xc78   :  { %v741_v50 = vpop.f32.mrb[6].mxu1 }
 0xc79   :  { %v745_v51 = vadd.f32 %v741_v50, %v221_v49  ;;  %v2106_v52 = vpop.f32.mrb[7].mxu1  ;;  %v230_v50 = vcombine.high %v228_v32, %v228_v32 }
 0xc7b   :  { %v1968_v53 = vmul.f32 -1.442695, %v745_v51 }
 0xc7d   :  { %2271 = vpow2.f32 %v1968_v53 }
 0xc87   :  { %v2272_v54 = vpop.eup %2271 }
 0xc88   :  { %v749_v55 = vadd.f32 1.0, %v2272_v54 }
 0xc8a   :  { %2273 = vrcp.f32 %v749_v55 }
 0xc94   :  { %v2274_v56 = vpop.eup %2273 }
 0xc95   :  { %v752_v57 = vmul.f32 2.0, %v2274_v56  ;;  %v754_v61 = vmul.f32 %v2274_v56, %v656_v43 }
 0xc97   :  { %v1969_v58 = vadd.f32 -1.0, %v752_v57 }
 0xc99   :  { %756 = vrot.lane.b32.xlu0 %v1969_v58, %s2427_s3 }
 0xd0b   :  { %v757_v59 = vpop.permute.xlu0 %756 }
 0xd0c   :  { %v759_v60 = vmul.f32 %v2274_v56, %v757_v59 }
 0xd0e   :  { %761 = vrot.lane.b32.xlu1 %v759_v60, %s2428_s0 }
 0xd80   :  { %v762_v62 = vpop.permute.xlu1 %761 }
 0xd81   :  { %v764_v63 = vadd.f32 %v762_v62, %v754_v61 }
 0xd83   :  { %2275 = vtanh.f32 %v764_v63 }
 0xd8d   :  { %v2276_v2 = vpop.eup %2275 }
 0xd8e   :  { %767 = vrot.lane.b32.xlu0 %v2276_v2, %s2427_s3 }
 0xe00   :  { %v768_v3 = vpop.permute.xlu0 %767 }
 0xe01   :  { %v770_v4 = vmul.f32 %v2274_v56, %v768_v3  ;;  %v1095_v3 = vld [vmem:[#allocation8] sm:$0xff] }
 0xe03   :  { %v778_v5 = vrot.slane %v770_v4, %v2620_v23  ;;  %v1096_v4 = vld [vmem:[#allocation8 + $0x8] sm:$0xff] }
 0xe05   :  { %779 = vrot.lane.b32.xlu1 %v778_v5, %s2428_s0  ;;  %v1097_v5 = vld [vmem:[#allocation8 + $0x10] sm:$0xff] }
 0xe77   :  { %v780_v6 = vpop.permute.xlu1 %779 }
 0xe78   :  { %2116 = vmatmul.mubr.msk.f32.vlgmr.msra.gmra.mrb[4].mxu0 %vm239_vm2, %v780_v6  ;;  %v2220_v6 = vpack.c.bf16 %v1096_v4, %v1095_v3 }
 0xe79   :  { %2215 = vmatpush3.bf16.msra.mxu0 %v2580_v8  ;;  %2137 = vmatprep.mubr.msk.f32.mxu0 %vm2424_vm0, %v2425_v1 }
 0xe7a   :  { %2216 = vmatprep.subr.bf16.mxu0 %v2423_v0 }
 0xe7d   :  { %2218 = vmatpush3.bf16.msra.mxu0 %v2592_v12 }
 0xf4b   :  { %v849_v9 = vpop.f32.mrb[4].mxu0 }
 0xf4c   :  { %v853_v10 = vadd.f32 %v849_v9, %v229_v7  ;;  %v2117_v11 = vpop.f32.mrb[5].mxu0  ;;  %v1098_v7 = vld [vmem:[#allocation8 + $0x18] sm:$0xff] }
 0xf4d   :  { %v2223_v9 = vpack.c.bf16 %v1098_v7, %v1097_v5  ;;  %v1190_v11 = vld [vmem:[%s2813_s6] sm:$0xff] }
 0xf4e   :  { %v1971_v13 = vmul.f32 -1.442695, %v853_v10  ;;  %2151 = vmatprep.subr.mxu0 %v1190_v11 }
 0xf50   :  { %2277 = vpow2.f32 %v1971_v13  ;;  %v1188_v13 = vld [vmem:[%s2811_s4] sm:$0xff] }
 0xf5a   :  { %v2278_v14 = vpop.eup %2277 }
 0xf5b   :  { %v857_v16 = vadd.f32 1.0, %v2278_v14  ;;  %v1189_v14 = vld [vmem:[%s2811_s4 + $0x8] sm:$0x3] }
 0xf5d   :  { %2279 = vrcp.f32 %v857_v16 }
 0xf67   :  { %v2280_v17 = vpop.eup %2279 }
 0xf68   :  { %v860_v19 = vmul.f32 2.0, %v2280_v17  ;;  %v862_v24 = vmul.f32 %v2280_v17, %v764_v63 }
 0xf6a   :  { %v1972_v21 = vadd.f32 -1.0, %v860_v19 }
 0xf6c   :  { %864 = vrot.lane.b32.xlu0 %v1972_v21, %s2427_s3 }
 0xfde   :  { %v865_v8 = vpop.permute.xlu0 %864 }
 0xfdf   :  { %v867_v22 = vmul.f32 %v2280_v17, %v865_v8 }
 0xfe1   :  { %869 = vrot.lane.b32.xlu1 %v867_v22, %s2428_s0  ;;  %v1505_v22 = vld [vmem:[#allocation9] sm:$0xff] }
0x1053   :  { %v870_v12 = vpop.permute.xlu1 %869 }
0x1054   :  { %v872_v25 = vadd.f32 %v870_v12, %v862_v24  ;;  %v1506_v24 = vld [vmem:[#allocation9 + $0x8] sm:$0xff] }
0x1055   :  { %v2225_v12 = vpack.c.bf16 %v1506_v24, %v1505_v22 }
0x1056   :  { %2281 = vtanh.f32 %v872_v25 }
0x1060   :  { %v2282_v26 = vpop.eup %2281 }
0x1061   :  { %875 = vrot.lane.b32.xlu0 %v2282_v26, %s2427_s3  ;;  %v1508_v26 = vld [vmem:[#allocation9 + $0x18] sm:$0xff] }
0x10d3   :  { %v876_v27 = vpop.permute.xlu0 %875 }
0x10d4   :  { %v878_v28 = vmul.f32 %v2280_v17, %v876_v27 }
0x10d6   :  { %v886_v29 = vrot.slane %v878_v28, %v2620_v23  ;;  %v2429_v28 = vmov 1966171168  }
0x10d8   :  { %887 = vrot.lane.b32.xlu1 %v886_v29, %s2428_s0  ;;  %v1277_v29 = vunpack.c.l.s4 %v2429_v28 }
0x114a   :  { %v888_v30 = vpop.permute.xlu1 %887 }
0x114b   :  { %2127 = vmatmul.mubr.msk.f32.vlgmr.msra.gmra.mrb[8].mxu1 %vm239_vm2, %v888_v30 }
0x114c   :  { %2148 = vmatprep.mubr.msk.f32.mxu1 %vm2424_vm0, %v2425_v1  ;;  %2221 = vmatpush3.bf16.msra.mxu1 %v2220_v6 }
0x114d   :  { %2222 = vmatprep.subr.bf16.mxu1 %v2423_v0 }
0x1150   :  { %2224 = vmatpush3.bf16.msra.mxu1 %v2223_v9 }
0x121e   :  { %v957_v33 = vpop.f32.mrb[8].mxu1 }
0x121f   :  { %v961_v34 = vadd.f32 %v957_v33, %v228_v32  ;;  %v2128_v35 = vpop.f32.mrb[9].mxu1 }
0x1221   :  { %v1974_v36 = vmul.f32 -1.442695, %v961_v34 }
0x1223   :  { %2283 = vpow2.f32 %v1974_v36 }
0x122d   :  { %v2284_v37 = vpop.eup %2283 }
0x122e   :  { %v965_v38 = vadd.f32 1.0, %v2284_v37 }
0x1230   :  { %2285 = vrcp.f32 %v965_v38 }
0x123a   :  { %v2286_v39 = vpop.eup %2285 }
0x123b   :  { %v968_v40 = vmul.f32 2.0, %v2286_v39  ;;  %v970_v20 = vmul.f32 %v2286_v39, %v872_v25  ;;  %v1507_v25 = vld [vmem:[#allocation9 + $0x10] sm:$0xff] }
0x123c   :  { %v2229_v27 = vpack.c.bf16 %v1508_v26, %v1507_v25 }
0x123d   :  { %v1975_v41 = vadd.f32 -1.0, %v968_v40  ;;  %v1381_v40 = vsub.s32 0, %v2613_v18 }
0x123f   :  { %972 = vrot.lane.b32.xlu0 %v1975_v41, %s2427_s3 }
0x12b1   :  { %v973_v42 = vpop.permute.xlu0 %972 }
0x12b2   :  { %v975_v1 = vmul.f32 %v2286_v39, %v973_v42 }
0x12b4   :  { %977 = vrot.lane.b32.xlu1 %v975_v1, %s2428_s0 }
0x1326   :  { %v978_v43 = vpop.permute.xlu1 %977 }
0x1327   :  { %v980_v44 = vadd.f32 %v978_v43, %v970_v20 }
0x1329   :  { %2287 = vtanh.f32 %v980_v44 }
0x1333   :  { %v2288_v45 = vpop.eup %2287 }
0x1334   :  { %983 = vrot.lane.b32.xlu0 %v2288_v45, %s2427_s3 }
0x13a6   :  { %v984_v46 = vpop.permute.xlu0 %983 }
0x13a7   :  { %v986_v47 = vmul.f32 %v2286_v39, %v984_v46 }
0x13a9   :  { %v994_v48 = vrot.slane %v986_v47, %v2620_v23 }
0x13ab   :  { %995 = vrot.lane.b32.xlu1 %v994_v48, %s2428_s0 }
0x141d   :  { %v996_v49 = vpop.permute.xlu1 %995 }
0x141e   :  { %2138 = vmatmul.mubr.msk.f32.vlgmr.msra.gmra.mrb[6].mxu0 %vm239_vm2, %v996_v49 }
0x141f   :  { %2153 = vmatprep.mubr.msk.f32.mxu0 %vm1191_vm3, %v1188_v13  ;;  %2152 = vmatpush3.msra.mxu0 %v1190_v11 }
0x1420   :  { %2226 = vmatprep.subr.bf16.mxu0 %v2225_v12 }
0x1422   :  { %2154 = vmatmul.mubr.msk.f32.vlgmr.msra.gmra.mrb[8].mxu0 %vm1191_vm3, %v1189_v14 }
0x1423   :  { %2228 = vmatpush3.bf16.msra.mxu0 %v2225_v12 }
0x1424   :  { %2230 = vmatprep.subr.bf16.mxu0 %v2229_v27 }
0x1427   :  { %2232 = vmatpush3.bf16.msra.mxu0 %v2229_v27 }
0x14f1   :  { %v1065_v51 = vpop.f32.mrb[6].mxu0 }
0x14f2   :  { %v1069_v52 = vadd.f32 %v1065_v51, %v230_v50  ;;  %v2139_v53 = vpop.f32.mrb[7].mxu0 }
0x14f4   :  { %v1977_v54 = vmul.f32 -1.442695, %v1069_v52 }
0x14f5   :  { %v2155_v21 = vpop.f32.mrb[8].mxu0 }
0x14f6   :  { %2289 = vpow2.f32 %v1977_v54  ;;  %v1264_v8 = vpop.f32.mrb[9].mxu0 }
0x14f7   :  { %v1275_v32 = vcombine.high %v1264_v8, %v1264_v8 }
0x1500   :  { %v2290_v55 = vpop.eup %2289 }
0x1501   :  { %v1073_v56 = vadd.f32 1.0, %v2290_v55 }
0x1503   :  { %2291 = vrcp.f32 %v1073_v56 }
0x150d   :  { %v2292_v57 = vpop.eup %2291 }
0x150e   :  { %v1076_v58 = vmul.f32 2.0, %v2292_v57  ;;  %v1078_v62 = vmul.f32 %v2292_v57, %v980_v44 }
0x1510   :  { %v1978_v59 = vadd.f32 -1.0, %v1076_v58 }
0x1512   :  { %1080 = vrot.lane.b32.xlu0 %v1978_v59, %s2427_s3 }
0x1584   :  { %v1081_v60 = vpop.permute.xlu0 %1080 }
0x1585   :  { %v1083_v61 = vmul.f32 %v2292_v57, %v1081_v60 }
0x1587   :  { %1085 = vrot.lane.b32.xlu1 %v1083_v61, %s2428_s0 }
0x15f9   :  { %v1086_v63 = vpop.permute.xlu1 %1085 }
0x15fa   :  { %v1088_v2 = vadd.f32 %v1086_v63, %v1078_v62 }
0x15fc   :  { %2293 = vtanh.f32 %v1088_v2 }
0x1606   :  { %v2294_v10 = vpop.eup %2293 }
0x1607   :  { %1091 = vrot.lane.b32.xlu0 %v2294_v10, %s2427_s3 }
0x1679   :  { %v1092_v0 = vpop.permute.xlu0 %1091 }
0x167a   :  { %v1094_v16 = vmul.f32 %v2292_v57, %v1092_v0 }
0x167c   :  { %v1113_v17 = vrot.slane %v1094_v16, %v2620_v23  ;;  %v1278_v23 = vunpack.c.0.s8 %v1277_v29 }
0x167e   :  { %1114 = vrot.lane.b32.xlu1 %v1113_v17, %s2428_s0  ;;  %v2722_v30 = vsub.s32 %v1278_v23, %v2613_v18 }
0x1680   :  { %v1282_v34 = vrot.slane %v1264_v8, %v2722_v30  ;;  %v1330_v37 = vrot.slane %v2155_v21, %v2722_v30  ;;  %v1289_v38 = vrot.slane %v1275_v32, %v2722_v30 }
0x1682   :  { %v1290_v41 = vcombine.high %v1282_v34, %v1282_v34  ;;  %v1331_v20 = vcombine.high %v1330_v37, %v1330_v37  ;;  %v1291_v43 = vcombine.high %v1289_v38, %v1289_v38  ;;  %v1298_v46 = vrot.slane %v1282_v34, %v2722_v30 }
0x1683   :  { %v1305_v47 = vrot.slane %v1289_v38, %v2722_v30  ;;  %v1338_v52 = vrot.slane %v1330_v37, %v2722_v30 }
0x1684   :  { %v1312_v48 = vrot.slane %v1290_v41, %v2722_v30  ;;  %v1345_v53 = vrot.slane %v1331_v20, %v2722_v30  ;;  %v1319_v54 = vrot.slane %v1291_v43, %v2722_v30  ;;  %v1320_v59 = vcombine.high %v1298_v46, %v1298_v46 }
0x1685   :  { %v1321_v60 = vcombine.high %v1305_v47, %v1305_v47 }
0x1686   :  { %v1322_v61 = vcombine.high %v1312_v48, %v1312_v48  ;;  %v1323_v5 = vcombine.high %v1319_v54, %v1319_v54 }
0x16f0   :  { %v1115_v19 = vpop.permute.xlu1 %1114 }
0x16f1   :  { %2149 = vmatmul.mubr.msk.f32.vlgmr.msra.gmra.mrb[10].mxu1 %vm239_vm2, %v1115_v19 }
0x17c4   :  { %v1184_v33 = vpop.f32.mrb[10].mxu1 }
0x17c5   :  { %v1185_v35 = vadd.f32 %v1979_v31, %v1184_v33  ;;  %v2150_v36 = vpop.f32.mrb[11].mxu1 }
0x17c7   :  { %v1363_v39 = vrot.slane %v1185_v35, %v2722_v30 }
0x17c9   :  { %v1364_v42 = vcombine.high %v1363_v39, %v1363_v39  ;;  %v1371_v1 = vrot.slane %v1363_v39, %v2722_v30 }
0x17cb   :  { %v1378_v44 = vrot.slane %v1364_v42, %v2722_v30  ;;  %v1382_v45 = vrot.slane %v1371_v1, %v1381_v40 }
0x17cd   :  { %v1386_v49 = vrot.slane %v1378_v44, %v1381_v40  ;;  %v1387_v50 = vcombine.high %v1382_v45, %v1382_v45  ;;  %v1394_v51 = vrot.slane %v1382_v45, %v2722_v30 }
0x17cf   :  { %v1401_v55 = vrot.slane %v1387_v50, %v2722_v30  ;;  %v1402_v56 = vcombine.high %v1394_v51, %v1394_v51  ;;  %v1426_v57 = vcombine.high %v1386_v49, %v1386_v49  ;;  %v1433_v58 = vrot.slane %v1386_v49, %v2722_v30 }
0x17d0   :  { %v1409_v62 = vrot.slane %v1394_v51, %v2722_v30 }
0x17d1   :  { %v1440_v63 = vrot.slane %v1426_v57, %v2722_v30  ;;  %v1441_v2 = vcombine.high %v1433_v58, %v1433_v58  ;;  %v1416_v3 = vrot.slane %v1401_v55, %v2722_v30  ;;  %v1423_v4 = vrot.slane %v1402_v56, %v2722_v30 }
0x17d2   :  { %v1424_v6 = vcombine.high %v1409_v62, %v1409_v62  ;;  %v1448_v7 = vrot.slane %v1433_v58, %v2722_v30  ;;  %v1475_v9 = vadd.f32 %v1409_v62, %v1298_v46 }
0x17d3   :  { %v1455_v10 = vrot.slane %v1440_v63, %v2722_v30  ;;  %v1462_v11 = vrot.slane %v1441_v2, %v2722_v30  ;;  %v1425_v13 = vcombine.high %v1423_v4, %v1423_v4  ;;  %v1476_v14 = vadd.f32 %v1423_v4, %v1312_v48 }
0x17d4   :  { %v1463_v0 = vcombine.high %v1448_v7, %v1448_v7  ;;  %v1477_v16 = vadd.f32 %v1424_v6, %v1320_v59  ;;  %v1479_v17 = vadd.f32 %v1416_v3, %v1305_v47  ;;  %v1480_v19 = vadd.f32 %v1448_v7, %v1319_v54 }
0x17d5   :  { %v1464_v21 = vcombine.high %v1462_v11, %v1462_v11  ;;  %v1484_v8 = vadd.f32 %v1455_v10, %v1345_v53  ;;  %v1478_v22 = vadd.f32 %v1425_v13, %v1322_v61  ;;  %v1481_v24 = vadd.f32 %v1462_v11, %v1321_v60  ;;  %v1983_v60 = vld [vmem:[%s2816_s9] ss:$0 sm:$0xff] }
0x17d6   :  { %v1482_v12 = vadd.f32 %v1463_v0, %v1323_v5  ;;  %v1485_v25 = vmul.f32 0.01, %v1475_v9  ;;  %v1486_v26 = vmul.f32 0.01, %v1476_v14  ;;  %v1487_v27 = vmul.f32 0.01, %v1477_v16 }
0x17d7   :  { %v1483_v28 = vadd.f32 %v1464_v21, %v1338_v52  ;;  %v1494_v29 = vmul.f32 0.01, %v1484_v8  ;;  %v1488_v23 = vmul.f32 0.01, %v1478_v22  ;;  %v1489_v31 = vmul.f32 0.01, %v1479_v17 }
0x17d8   :  { %v1490_v32 = vmul.f32 0.01, %v1480_v19  ;;  %v1491_v33 = vmul.f32 0.01, %v1481_v24  ;;  %v1492_v34 = vmul.f32 0.01, %v1482_v12  ;;  %v1495_v36 = vmax.f32 %v1475_v9, %v1485_v25 }
0x17d9   :  { %v1493_v35 = vmul.f32 0.01, %v1483_v28  ;;  %v1496_v37 = vmax.f32 %v1476_v14, %v1486_v26  ;;  %v1497_v38 = vmax.f32 %v1477_v16, %v1487_v27  ;;  %v1498_v39 = vmax.f32 %v1478_v22, %v1488_v23  ;;  %v1986_v61 = vld [vmem:[%s2817_s10] ss:$0 sm:$0xff] }
0x17da   :  { %v1499_v40 = vmax.f32 %v1479_v17, %v1489_v31  ;;  %v1500_v41 = vmax.f32 %v1480_v19, %v1490_v32  ;;  %v1501_v42 = vmax.f32 %v1481_v24, %v1491_v33  ;;  %v1504_v20 = vmax.f32 %v1484_v8, %v1494_v29 }
0x17db   :  { %v1503_v1 = vmax.f32 %v1483_v28, %v1493_v35  ;;  %v1502_v43 = vmax.f32 %v1482_v12, %v1492_v34  ;;  %v1526_v44 = vcombine.low %v1495_v36, %v1496_v37  ;;  %v1527_v45 = vcombine.low %v1497_v38, %v1498_v39 }
0x17dc   :  { %v1528_v46 = vcombine.low %v1499_v40, %v1500_v41  ;;  %v1769_v2 = vrot.slane %v1986_v61, %v2722_v30  ;;  %v1762_v6 = vcombine.high %v1986_v61, %v1986_v61 }
0x17dd   :  { %v1575_v47 = vcombine.low %v1503_v1, %v1504_v20  ;;  %v1529_v48 = vcombine.low %v1501_v42, %v1502_v43  ;;  %v1536_v49 = vrot.slane %v1526_v44, %v2722_v30  ;;  %v1543_v50 = vrot.slane %v1527_v45, %v2722_v30 }
0x17de   :  { %v1550_v51 = vrot.slane %v1528_v46, %v2722_v30  ;;  %v1777_v10 = vcombine.high %v1769_v2, %v1769_v2  ;;  %v1784_v14 = vrot.slane %v1769_v2, %v2722_v30  ;;  %v1776_v0 = vrot.slane %v1762_v6, %v2722_v30 }
0x17df   :  { %v1557_v52 = vrot.slane %v1529_v48, %v2722_v30  ;;  %v1558_v53 = vcombine.low %v1536_v49, %v1543_v50  ;;  %v1582_v55 = vrot.slane %v1575_v47, %v2722_v30 }
0x17e0   :  { %v1798_v21 = vrot.slane %v1777_v10, %v2722_v30  ;;  %v1799_v12 = vcombine.high %v1784_v14, %v1784_v14  ;;  %v1791_v25 = vrot.slane %v1776_v0, %v2722_v30 }
0x17e1   :  { %v1559_v54 = vcombine.low %v1550_v51, %v1557_v52  ;;  %v1566_v56 = vrot.slane %v1558_v53, %v2722_v30  ;;  %v1589_v59 = vrot.slane %v1582_v55, %v2722_v30 }
0x17e2   :  { %v1800_v32 = vcombine.high %v1798_v21, %v1798_v21 }
0x17e3   :  { %v1573_v57 = vrot.slane %v1559_v54, %v2722_v30 }
0x17e5   :  { %v1574_v58 = vcombine.low %v1566_v56, %v1573_v57 }
0x17e7   :  { %2164 = vmatprep.mubr.msk.f32.mxu0 %vm239_vm2, %v1574_v58 }
0x17e8   :  { %2165 = vmatmul.mubr.msk.f32.vlgmr.msra.gmra.mrb[10].mxu0 %vm239_vm2, %v1589_v59 }
0x18bb   :  { %v2166_v62 = vpop.f32.mrb[10].mxu0 }
0x18bc   :  { %v1666_v63 = vadd.f32 %v2166_v62, %v1983_v60  ;;  %v1660_v3 = vpop.f32.mrb[11].mxu0 }
0x18bd   :  { %v1661_v4 = vadd.f32 %v1983_v60, %v1660_v3  ;;  %v1914_v3 = vstv %s2818_s11  ;;  %s2387_s11 = scalar_lea.vmem %s1943_s5, 32 }
0x18be   :  { %v1670_v5 = vmul.f32 0.01, %v1666_v63  ;;  %p2388_p4 = scmp.ne.s32.totalorder %s1943_s5, %s2387_s11  ;;  %p2393_p6 = scmp.lt.s32.totalorder %s2387_s11, %s2387_s11 }
0x18bf   :  { %v1669_v7 = vmul.f32 0.01, %v1661_v4 }
0x18c0   :  { %v1672_v9 = vmax.f32 %v1666_v63, %v1670_v5  ;;  %p2394_p7 = por %p2393_p6, %p2392_p5 }
0x18c1   :  { %v1671_v11 = vmax.f32 %v1661_v4, %v1669_v7 }
0x18c2   :  { %v1730_v13 = vrot.slane %v1672_v9, %v2722_v30  ;;  %v1922_v9 = vand.u32 127, %v201_v15  ;;  %p2395_p8 = pnand %p2394_p7, %p2388_p4 }
0x18c3   :  { %v1675_v16 = vcombine.high %v1671_v11, %v1671_v11  ;;  %v1682_v17 = vrot.slane %v1671_v11, %v2722_v30 }
0x18c4   :  { %v1731_v19 = vcombine.high %v1730_v13, %v1730_v13  ;;  %v1738_v23 = vrot.slane %v1730_v13, %v2722_v30  ;;  %v1925_v10 = vsub.s32 %v1922_v9, %v2613_v18 }
0x18c5   :  { %v1689_v8 = vrot.slane %v1675_v16, %v2722_v30  ;;  %v1690_v22 = vcombine.high %v1682_v17, %v1682_v17  ;;  %v1698_v24 = vrot.slane %v1682_v17, %v2722_v30 }
0x18c6   :  { %v1745_v31 = vrot.slane %v1731_v19, %v2722_v30  ;;  %v1814_v43 = vmul.f32 %v1800_v32, %v1738_v23 }
0x18c7   :  { %v1691_v26 = vcombine.high %v1689_v8, %v1689_v8  ;;  %v1705_v27 = vrot.slane %v1689_v8, %v2722_v30  ;;  %v1712_v28 = vrot.slane %v1690_v22, %v2722_v30  ;;  %v1720_v29 = vcombine.high %v1698_v24, %v1698_v24 }
0x18c8   :  { %v1806_v33 = vmul.f32 %v1784_v14, %v1698_v24  ;;  %v1815_v46 = vmul.f32 %v1791_v25, %v1745_v31 }
0x18c9   :  { %v1719_v34 = vrot.slane %v1691_v26, %v2722_v30  ;;  %v1721_v35 = vcombine.high %v1705_v27, %v1705_v27  ;;  %v1722_v36 = vcombine.high %v1712_v28, %v1712_v28  ;;  %v1807_v37 = vmul.f32 %v1798_v21, %v1712_v28 }
0x18ca   :  { %v1808_v38 = vmul.f32 %v1799_v12, %v1720_v29  ;;  %v1810_v39 = vmul.f32 %v1791_v25, %v1705_v27  ;;  %v1887_v55 = vrot.slane %v1815_v46, %v2722_v30 }
0x18cb   :  { %v1723_v40 = vcombine.high %v1719_v34, %v1719_v34  ;;  %v1809_v41 = vmul.f32 %v1800_v32, %v1722_v36  ;;  %v1826_v42 = vcombine.low %v1806_v33, %v1807_v37  ;;  %v1811_v1 = vmul.f32 %v1784_v14, %v1719_v34 }
0x18cc   :  { %v1812_v20 = vmul.f32 %v1798_v21, %v1721_v35  ;;  %v1848_v50 = vrot.slane %v1810_v39, %v2722_v30  ;;  %v1902_v61 = vrot.slane %v1887_v55, %v2722_v30 }
0x18cd   :  { %v1827_v44 = vcombine.low %v1808_v38, %v1809_v41  ;;  %v1813_v45 = vmul.f32 %v1799_v12, %v1723_v40  ;;  %v1834_v48 = vrot.slane %v1826_v42, %v2722_v30 }
0x18ce   :  { %v1865_v47 = vcombine.low %v1811_v1, %v1812_v20  ;;  %v1863_v57 = vrot.slane %v1848_v50, %v2722_v30 }
0x18cf   :  { %v1841_v49 = vrot.slane %v1827_v44, %v2722_v30  ;;  %v1866_v51 = vcombine.low %v1813_v45, %v1814_v43 }
0x18d0   :  { %v1873_v53 = vrot.slane %v1865_v47, %v2722_v30 }
0x18d1   :  { %v1849_v52 = vcombine.low %v1834_v48, %v1841_v49  ;;  %v1880_v54 = vrot.slane %v1866_v51, %v2722_v30 }
0x18d3   :  { %v1856_v56 = vrot.slane %v1849_v52, %v2722_v30  ;;  %v1888_v58 = vcombine.low %v1873_v53, %v1880_v54 }
0x18d5   :  { %v1864_v59 = vcombine.low %v1856_v56, %v1863_v57  ;;  %v1895_v60 = vrot.slane %v1888_v58, %v2722_v30 }
0x18d7   :  { %v1907_v62 = vsel %vm1906_vm4, %v1864_v59, 0.0  ;;  %v1903_v63 = vcombine.low %v1895_v60, %v1902_v61 }
0x18d8   :  { %1908 = vadd.xlane.f32.xlu0 %v1907_v62 }
0x18d9   :  { %v1910_v2 = vsel %vm1906_vm4, %v1903_v63, 0.0 }
0x18da   :  { %1911 = vadd.xlane.f32.xlu1 %v1910_v2 }
0x1965   :  { %v1909_v4 = vpop.xlane.xlu0 %1908 }
0x1966   :  { %v1915_v5 = vadd.f32 %v1914_v3, %v1909_v4 }
0x1967   :  { %v1912_v6 = vpop.xlane.xlu1 %1911 }
0x1968   :  { %2295 = vtanh.f32 %v1915_v5  ;;  %v1916_v7 = vadd.f32 %v1914_v3, %v1912_v6 }
0x196a   :  { %2297 = vtanh.f32 %v1916_v7 }
0x1972   :  { %v2296_v30 = vpop.eup %2295 }
0x1973   :  { %v1926_v13 = vrot.slane %v2296_v30, %v1925_v10 }
0x1974   :  { %v2298_v11 = vpop.eup %2297 }
0x1975   :  { %v1930_v14 = vrot.slane %v2298_v11, %v1925_v10 }
0x1977   :  { %v1932_v0 = vsel %vm1931_vm5, %v1930_v14, %v1926_v13 }
0x1978   :  { %1935 = vst.msk [vmem:[#allocation11] sm:$0x3] %vm1934_vm6, %v1932_v0 }
0x1979   :  { %2398 = shalt.err (!%p2395_p8)
}
0x197a   :  { %s2399_s15 = scalar_lea.hbm %s2819_s12, 32 }
0x197b   :  { %p2400_p9 = scmp.ne.s32.totalorder %s2819_s12, %s2399_s15  ;;  %p2403_p10 = scmp.lt.u32.totalorder %s2399_s15, %s2819_s12 }
0x197d   :  { %p2405_p11 = pnand %p2403_p10, %p2400_p9 }
0x197f   :  { %2408 = shalt.err (!%p2405_p11)
}
0x1980   :  { %1945 = dma.vmem_to_hbm [thread:$0]  %s1943_s5, 32, %s2819_s12, [#allocation5]  }
0x1981   :  { %2415 = dma.done.wait [#allocation5], 32  }
0x1982   :  { %2416 = vsyncadd [#allocation5], 4294967264 }
0x1983   :  { %1949 = vsyncpa [#allocation4], 1 }
0x1984   :  { %1950 = vsyncpa [#allocation7], 1 }
0x1985   :  { %1951 = vsyncpa [#allocation10], 1 }
0x1986   :  { %1952 = vsyncpa [#allocation5], 1 }

</bundles_post_ra>
